<compile_context>
chip_gen: v7x
topology: tpu7x:2x2x1
jax: 0.10.0
libtpu: 0.0.40
codegen_flags: <defaults>
</compile_context>

<pallas_src>
import jax
import jax.numpy as jnp
from jax.experimental import pallas as pl
from jax.experimental.pallas import tpu as pltpu


def _patch_embed_kernel(x_ref, w_ref, b_ref, o_ref):
    # x_ref: (tm, Kp) bf16 patch tile; w_ref: (Kp, Ep) bf16 resident weight;
    # b_ref: (1, Ep) f32 bias.  f32 accumulation on the MXU, bias added in f32.
    acc = jnp.dot(x_ref[...], w_ref[...], preferred_element_type=jnp.float32)
    o_ref[...] = (acc + b_ref[...]).astype(o_ref.dtype)


def _cdiv(a, b):
    return -(-a // b)


def _round_up(a, b):
    return _cdiv(a, b) * b


_SUB = 16  # bf16 sublane packing granule


def _choose_tile_m(M, Kp, Ep, out_bytes, tile_m_cap, vmem_budget):
    """Largest 16-row-granular row tile that (a) keeps the double-buffered
    working set under the scoped-VMEM budget (v5e's 16 MiB default is the
    binding one) and (b) yields >=2, preferably even, grid steps so v7x's two
    TensorCores both get work (free on single-TC v5e/v6e)."""
    per_row = 2 * Kp * 2 + 2 * Ep * out_bytes           # x + out, double-buffered
    resident = 2 * Kp * Ep * 2 + 2 * Ep * 4              # weight + bias buffers
    avail = max(vmem_budget - resident, _SUB * per_row)
    tm_vmem = max(_SUB, (avail // per_row) // _SUB * _SUB)
    tm = min(tile_m_cap, tm_vmem)
    if M <= tm:
        if M >= 2 * _SUB:
            return _round_up(_cdiv(M, 2), _SUB)           # two balanced tiles
        return M                                          # one full-extent block
    steps = _cdiv(M, tm)
    if steps % 2 == 1:                                    # even step count (v7x)
        steps += 1
    return max(_SUB, _round_up(_cdiv(M, steps), _SUB))


def patch_embed_forward(x, weight, bias, patch_size, *,
                        tile_m=1024,
                        compute_dtype=jnp.bfloat16,
                        out_dtype=None,
                        vmem_budget_bytes=12 * 1024 * 1024):
    """
    x:      (B, C, H, W)  float32, NCHW (PyTorch convention)
    weight: (E, C, p, p)  float32, PyTorch Conv2d weight layout
    bias:   (E,)          float32
    Returns (out, (Gh, Gw)) with out of shape (B, Gh*Gw, E) in out_dtype
    (default: compute_dtype = bf16; pass out_dtype=jnp.float32 for f32 parity).
    """
    B, C, H, W = x.shape
    E = weight.shape[0]
    p = patch_size
    assert H % p == 0 and W % p == 0
    Gh, Gw = H // p, W // p
    N = Gh * Gw
    K = C * p * p
    M = B * N
    out_dtype = compute_dtype if out_dtype is None else out_dtype
    out_bytes = jnp.dtype(out_dtype).itemsize

    # --- patch extraction (cast + transpose + reshape + K lane-pad).  Column
    # order (c, kh, kw) matches the flattened Conv2d weight.  Written in
    # compute_dtype; allow_input_fusion below lets XLA fold this chain into
    # the pallas_call input DMA so it need not materialize in HBM. ---
    Kp = _round_up(K, 128)                                # lane-dense contraction
    Ep = _round_up(E, 128)                                # lane-dense output
    xp = x.astype(compute_dtype).reshape(B, C, Gh, p, Gw, p)
    xp = jnp.transpose(xp, (0, 2, 4, 1, 3, 5)).reshape(M, K)
    if Kp != K:
        xp = jnp.pad(xp, ((0, 0), (0, Kp - K)))

    # --- projection weights: (E, C, p, p) -> (Kp, Ep) zero-padded ---
    w2d = weight.reshape(E, K).T.astype(compute_dtype)    # (K, E)
    b2d = bias.astype(jnp.float32).reshape(1, E)
    if Kp != K:
        w2d = jnp.pad(w2d, ((0, Kp - K), (0, 0)))         # zero rows: free numerically
    if Ep != E:
        w2d = jnp.pad(w2d, ((0, 0), (0, Ep - E)))
        b2d = jnp.pad(b2d, ((0, 0), (0, Ep - E)))

    tm = _choose_tile_m(M, Kp, Ep, out_bytes, tile_m, vmem_budget_bytes)
    grid_m = _cdiv(M, tm)        # no jnp.pad over M: partial last block is masked

    # Raise the scoped-VMEM limit only when a caller-supplied tile_m (e.g. a
    # tm=2048 sweep on v6e's 128 MiB part) pushes past the ~16-32 MiB defaults.
    est_vmem = tm * (2 * Kp * 2 + 2 * Ep * out_bytes) + 2 * Kp * Ep * 2 + 2 * Ep * 4
    vmem_limit = est_vmem + (8 << 20) if est_vmem > (24 << 20) else None

    out_flat = pl.pallas_call(
        _patch_embed_kernel,
        out_shape=jax.ShapeDtypeStruct((M, Ep), out_dtype),
        grid_spec=pltpu.PrefetchScalarGridSpec(
            num_scalar_prefetch=0,
            grid=(grid_m,),
            in_specs=[
                pl.BlockSpec((tm, Kp), lambda i: (i, 0)),   # streamed patches
                # TODO(synk): pipeline_mode=pl.Buffered(1) would single-buffer
                # the resident weight/bias (constant index_map, no re-DMA) and
                # free ~Kp*Ep*2 bytes of VMEM; left at the default 2-deep
                # pipeline for lowering portability across JAX versions.
                pl.BlockSpec((Kp, Ep), lambda i: (0, 0)),   # resident weight
                pl.BlockSpec((1, Ep), lambda i: (0, 0)),    # resident f32 bias
            ],
            out_specs=pl.BlockSpec((tm, Ep), lambda i: (i, 0)),
        ),
        compiler_params=pltpu.CompilerParams(
            # Independent row tiles: megacore / v7x dual-TC sharding over M.
            dimension_semantics=("parallel",),
            # Let XLA fuse the extraction chain into the patch-operand DMA.
            allow_input_fusion=[True, False, False],
            vmem_limit_bytes=vmem_limit,
        ),
        cost_estimate=pl.CostEstimate(
            flops=2 * M * Kp * Ep,
            transcendentals=0,
            bytes_accessed=M * Kp * 2 + Kp * Ep * 2 + Ep * 4 + M * Ep * out_bytes,
        ),
    )(xp, w2d, b2d)

    out = out_flat[:, :E].reshape(B, N, E)
    # norm_layer=None in the reference -> nn.Identity(), nothing to apply.
    return out, (Gh, Gw)


if __name__ == "__main__":
    # Small shapes consistent with the module: img_size=16, patch_size=4,
    # in_c=4, embed_dim=32, batch=2.
    B, C, H, W = 2, 4, 16, 16
    p = 4
    E = 32

    key = jax.random.PRNGKey(0)
    kx, kw, kb = jax.random.split(key, 3)
    x = jax.random.normal(kx, (B, C, H, W), dtype=jnp.float32)
    weight = jax.random.normal(kw, (E, C, p, p), dtype=jnp.float32) * 0.02
    bias = jax.random.normal(kb, (E,), dtype=jnp.float32) * 0.02

    out, (Gh, Gw) = patch_embed_forward(x, weight, bias, p)
    out = jax.block_until_ready(out)

    # Sanity-check against a pure-JAX f32 reference of the strided conv.
    ref = jax.lax.conv_general_dilated(
        x, weight, window_strides=(p, p), padding="VALID",
        dimension_numbers=("NCHW", "OIHW", "NCHW"),
    ) + bias.reshape(1, E, 1, 1)
    ref = ref.reshape(B, E, Gh * Gw).transpose(0, 2, 1)
    assert out.shape == (B, Gh * Gw, E)
    # bf16 matmul inputs + bf16 output (f32 accumulate) vs f32 reference.
    assert jnp.allclose(out.astype(jnp.float32), ref, atol=2e-2, rtol=2e-2)

    print("KERNEL_OK")
</pallas_src>

<mosaic_0001>
module attributes {stable_mosaic.version = 11 : i64} {
  func.func @_patch_embed_kernel(%arg0: i32, %arg1: memref<16x128xbf16, #tpu.memory_space<vmem>>, %arg2: memref<128x128xbf16, #tpu.memory_space<vmem>>, %arg3: memref<1x128xf32, #tpu.memory_space<vmem>>, %arg4: memref<16x128xbf16, #tpu.memory_space<vmem>>) attributes {dimension_semantics = [#tpu.dimension_semantics<parallel>], iteration_bounds = array<i64: 2>, scalar_prefetch = 0 : i64, scratch_operands = 0 : i64, tpu.core_type = #tpu.core_type<tc>, window_params = [{transform_indices = @transform_0, window_bounds = array<i64: 16, 128>}, {pipeline_mode = #tpu.pipeline_mode<synchronous>, transform_indices = @transform_1, window_bounds = array<i64: 128, 128>}, {pipeline_mode = #tpu.pipeline_mode<synchronous>, transform_indices = @transform_2, window_bounds = array<i64: 1, 128>}, {transform_indices = @transform_3, window_bounds = array<i64: 16, 128>}]} {
    %c0 = arith.constant 0 : index
    %c0_0 = arith.constant 0 : index
    %0 = vector.load %arg1[%c0, %c0_0] : memref<16x128xbf16, #tpu.memory_space<vmem>>, vector<16x128xbf16>
    %c0_1 = arith.constant 0 : index
    %c0_2 = arith.constant 0 : index
    %1 = vector.load %arg2[%c0_1, %c0_2] : memref<128x128xbf16, #tpu.memory_space<vmem>>, vector<128x128xbf16>
    %cst = arith.constant dense<0.000000e+00> : vector<16x128xf32>
    %2 = tpu.matmul %0, %1, %cst {dimension_numbers = #tpu.dot_dimension_numbers<[1], [0], [0], [1], [0, 0, 1, 1], [], []>} : vector<16x128xbf16>, vector<128x128xbf16>, vector<16x128xf32> -> vector<16x128xf32>
    %c0_3 = arith.constant 0 : index
    %c0_4 = arith.constant 0 : index
    %3 = vector.load %arg3[%c0_3, %c0_4] : memref<1x128xf32, #tpu.memory_space<vmem>>, vector<1x128xf32>
    %4 = vector.broadcast %3 : vector<1x128xf32> to vector<16x128xf32>
    %5 = arith.addf %2, %4 : vector<16x128xf32>
    %6 = arith.truncf %5 : vector<16x128xf32> to vector<16x128xbf16>
    %c0_5 = arith.constant 0 : index
    %c0_6 = arith.constant 0 : index
    %7 = vector.load %arg4[%c0_5, %c0_6] : memref<16x128xbf16, #tpu.memory_space<vmem>>, vector<16x128xbf16>
    tpu.vector_store %arg4[%c0_5, %c0_6], %6 {strides = array<i32>} : memref<16x128xbf16, #tpu.memory_space<vmem>>, vector<16x128xbf16>,
    return
  }
  func.func @transform_0(%arg0: i32) -> (i32, i32) {
    %c0_i32 = arith.constant 0 : i32
    %c0_i32_0 = arith.constant 0 : i32
    return %arg0, %c0_i32 : i32, i32
  }
  func.func @transform_1(%arg0: i32) -> (i32, i32) {
    %c0_i32 = arith.constant 0 : i32
    %c0_i32_0 = arith.constant 0 : i32
    %c0_i32_1 = arith.constant 0 : i32
    return %c0_i32, %c0_i32_0 : i32, i32
  }
  func.func @transform_2(%arg0: i32) -> (i32, i32) {
    %c0_i32 = arith.constant 0 : i32
    %c0_i32_0 = arith.constant 0 : i32
    %c0_i32_1 = arith.constant 0 : i32
    return %c0_i32, %c0_i32_0 : i32, i32
  }
  func.func @transform_3(%arg0: i32) -> (i32, i32) {
    %c0_i32 = arith.constant 0 : i32
    %c0_i32_0 = arith.constant 0 : i32
    return %arg0, %c0_i32 : i32, i32
  }
}

</mosaic_0001>

<bundles_post_ra>
// kernel: tpu_custom_call.1
= control target key start
LH: loop header
LB: loop body
LE: loop exit
PB: predicated region body
PF: predicated region fallthrough
CT: control target
= control target key end

     0   :  { %8 = vsyncpa [#allocation3], 0  ;;  %s948_s0 = inlined_call_operand.hbm [shape: bf16[32,128], index: 0, kind: input, shape index: {}]   ;;  %s949_s1 = inlined_call_operand.hbm [shape: bf16[128,128], index: 1, kind: input, shape index: {}]   ;;  %s950_s2 = inlined_call_operand.vmem [shape: f32[1,128], index: 2, kind: input, shape index: {}]   ;;  %s951_s3 = inlined_call_operand.hbm [shape: bf16[32,128], index: 3, kind: output, shape index: {}]  }
   0x1   :  { %10 = vsyncpa [#allocation3 + $0x1], 0 }
   0x2   :  { %11 = vsyncpa [#allocation6], 0 }
   0x3   :  { %12 = vsyncpa [#allocation4], 0 }
   0x4   :  { %14 = vsyncpa [#allocation4 + $0x1], 0  ;;  %s731_s12 = smov 0   ;;  %s733_s13 = smov 0  }
   0x5   :  { %s735_s14 = smov 0   ;;  %s737_s15 = smov 0  }
   0x6 LB: > { %s752_s16 = sadd.s32 4294967295, %s700_s15   ;;  %s434_s17 = sadd.s32 4294967294, %s700_s15   ;;  %s700_s15 = sphi %s737_s15, %s971_s15   ;;  %s696_s14 = sphi %s735_s14, %s970_s14   ;;  %s692_s13 = sphi %s733_s13, %s969_s13   ;;  %s688_s12 = sphi %s731_s12, %s968_s12  }
   0x7   : > { %p40_p0 = scmp.ne.s32.totalorder %s692_s13, %s688_s12  ;;  %p952_p1 = scmp.eq.s32.totalorder %s752_s16, 0 }
   0x8   : > { %p112_p3 = scmp.eq.s32.totalorder %s434_s17, 1  ;;  %p435_p5 = scmp.ge.s32.totalorder %s700_s15, 1 }
   0x9   : > { %p761_p4 = por %p952_p1, %p40_p0  ;;  %p119_p7 = scmp.lt.s32.totalorder %s700_s15, 3 }
   0xa   : > { %p766_p6 = por %p112_p3, %p40_p0  ;;  %s702_s21 = smov [#allocation5]  }
   0xb   : > { %s955_s18 = scalar_select %p761_p4, 1, 0 }
   0xc   : > { %s956_s19 = scalar_select %p766_p6, 1, 0 }
   0xd   : > { %p771_p8 = pnand %p435_p5, %p119_p7  ;;  %s131_s22 = sshll.u32 %s702_s21, 4  ;;  %s775_s22 = int_to_ptr.vmem [resolvable:$true] %s131_s22 }
   0xe   : > { %s787_s24 = sadd.s32 1, %s700_s15   ;;  %s27_s25 = sadd.s32 1, %s696_s14 }
   0xf   : > { %s957_s20 = scalar_select %p771_p8, 1, 0 }
  0x10   : > { %p508_p9 = pneg %p771_p8  ;;  %s24_s26 = ssub.s32 %s700_s15, %s787_s24 }
  0x11   : > { %s572_s29 = scalar_lea.hbm %s949_s1, 1024 }
  0x12   : > { %p782_p11 = pnand %p508_p9, %p952_p1  ;;  %p573_p12 = scmp.ne.s32.totalorder %s949_s1, %s572_s29 }
  0x13   : > { %p579_p5 = scmp.lt.u32.totalorder %s572_s29, %s949_s1 }
  0x14   : > { %p574_p13 = pneg %p782_p11 }
  0x16   : > { %p575_p0 = pnand %p574_p13, %p573_p12 }
  0x18   : > { %p576_p3 = pneg %p575_p0 }
  0x1a   : > { %p581_p7 = pnand %p579_p5, %p576_p3 }
  0x1c   : > { %584 = shalt.err (!%p581_p7)
}
  0x1d   : > { %s585_s7 = scalar_lea.vmem %s775_s22, 1024  ;;  %p593_p2 = scmp.lt.s32.totalorder %s775_s22, %s775_s22 }
  0x1e   : > { %p586_p9 = scmp.ne.s32.totalorder %s775_s22, %s585_s7  ;;  %p594_p6 = scmp.lt.s32.totalorder %s585_s7, %s585_s7 }
  0x20   : > { %p588_p10 = pnand %p586_p9, %p574_p13  ;;  %p595_p4 = por %p594_p6, %p593_p2 }
  0x22   : > { %p589_p1 = pneg %p588_p10 }
  0x24   : > { %p596_p8 = pnand %p595_p4, %p589_p1 }
  0x26   : > { %599 = shalt.err (!%p596_p8)
}
  0x27   : > { %s703_s8 = smov 64   ;;  %s704_s9 = smov 4  }
  0x28   : > { %511 = dma.hbm_to_vmem [thread:$0]  (!%p782_p11), %s949_s1, 1024, %s775_s22, [#allocation6], %s703_s8, %s703_s8, %s704_s9  }
  0x29   : > { %p25_p1 = scmp.eq.s32.totalorder %s24_s26, 0  ;;  %p34_p2 = scmp.ne.s32.totalorder %s696_s14, %s692_s13 }
  0x2a   : > { %p35_p4 = scmp.eq.s32.totalorder %s700_s15, 0  ;;  %p521_p6 = scmp.lt.s32.totalorder %s700_s15, 2 }
  0x2b   : > { %s821_s17 = scalar_select %p25_p1, %s696_s14, %s27_s25  }
  0x2c   : > { %p36_p8 = por %p35_p4, %p34_p2  ;;  %p959_p10 = scmp.eq.s32.totalorder %s752_s16, 1 }
  0x2d   : > { %s148_s23 = sand.u32 1, %s696_s14   ;;  %s462_s27 = sshll.u32 %s700_s15, 7 }
  0x2e   : > { %p825_p12 = por %p959_p10, %p34_p2  ;;  %s438_s28 = sshll.u32 %s148_s23, 3 }
  0x2f   : > { %s834_s4 = scalar_lea.hbm %s948_s0, %s462_s27  ;;  %s152_s22 = scalar_lea.vmem [#allocation2], %s438_s28 }
  0x30   : > { %s159_s25 = sshll.u32 %s152_s22, 4  ;;  %p836_p11 = pnand %p521_p6, %p36_p8  ;;  %s840_s25 = int_to_ptr.vmem [resolvable:$true] %s159_s25 }
  0x31   : > { %s842_s5 = scalar_lea.sflag [#allocation3], %s148_s23  ;;  %s600_s6 = scalar_lea.hbm %s834_s4, 128 }
  0x32   : > { %p601_p13 = scmp.ne.s32.totalorder %s834_s4, %s600_s6  ;;  %p602_p0 = pneg %p836_p11 }
  0x33   : > { %s605_s11 = scalar_lea.hbm %s948_s0, 256  ;;  %p606_p7 = scmp.lt.u32.totalorder %s834_s4, %s948_s0 }
  0x34   : > { %p603_p3 = pnand %p602_p0, %p601_p13  ;;  %p607_p9 = scmp.lt.u32.totalorder %s605_s11, %s600_s6 }
  0x35   : > { %p609_p2 = scmp.lt.u32.totalorder %s600_s6, %s834_s4 }
  0x36   : > { %p604_p5 = pneg %p603_p3  ;;  %p608_p1 = por %p607_p9, %p606_p7 }
  0x38   : > { %p610_p4 = por %p609_p2, %p608_p1 }
  0x3a   : > { %p611_p6 = pnand %p610_p4, %p604_p5 }
  0x3c   : > { %614 = shalt.err (!%p611_p6)
}
  0x3d   : > { %s615_s23 = scalar_lea.vmem %s840_s25, 128  ;;  %s705_s29 = smov [#allocation2]  }
  0x3e   : > { %p616_p8 = scmp.ne.s32.totalorder %s840_s25, %s615_s23  ;;  %s620_s30 = sshll.u32 %s705_s29, 4  ;;  %s621_s30 = int_to_ptr.vmem [resolvable:$false] %s620_s30 }
  0x3f   : > { %s622_s22 = scalar_lea.vmem %s621_s30, 256  ;;  %p623_p3 = scmp.lt.s32.totalorder %s840_s25, %s621_s30 }
  0x40   : > { %p618_p10 = pnand %p616_p8, %p602_p0  ;;  %p624_p7 = scmp.lt.s32.totalorder %s622_s22, %s615_s23 }
  0x42   : > { %p619_p13 = pneg %p618_p10  ;;  %p625_p9 = por %p624_p7, %p623_p3 }
  0x44   : > { %p626_p1 = pnand %p625_p9, %p619_p13 }
  0x46   : > { %629 = shalt.err (!%p626_p1)
}
  0x47   : > { %515 = dma.hbm_to_vmem [thread:$0]  (!%p836_p11), %s834_s4, 128, %s840_s25, %s842_s5, %s703_s8, %s703_s8, %s704_s9  }
  0x48   : > { %p962_p0 = scmp.ne.s32.totalorder %s957_s20, 0 }
  0x49   : > { %s876_s6 = sand.u32 (!%p962_p0), 1, %s692_s13   ;;  %p963_p5 = scmp.ne.s32.totalorder (!%p962_p0), %s955_s18, 0 }
  0x4a   : > { %171 = sbr.rel (%p962_p0) target bundleno = 351 (0x15f), region = 32  ;;  %s442_s7 = sshll.u32 (!%p962_p0), %s876_s6, 3 }
  0x4b   : > { %s174_s10 = scalar_lea.sflag (!%p962_p0), [#allocation3], %s876_s6  ;;  %s882_s26 = scalar_lea.vmem (!%p962_p0), [#allocation2], %s442_s7 }
  0x51   : > { %675 = dma.done.wait (%p963_p5), %s174_s10, 128  }
  0x52   : > { %677 = vsyncadd (%p963_p5), %s174_s10, 4294967168  ;;  %p964_p11 = scmp.eq.s32.totalorder %s752_s16, 0 }
  0x54   : > { %679 = dma.done.wait (%p964_p11), [#allocation6], 1024   ;;  %p965_p2 = pmov %p964_p11 }
  0x55   : > { %v706_v0 = vmov 0.0   ;;  %vm707_vm0 = vmmov 0   ;;  %v563_v1 = vld [vmem:[#allocation5] sm:$0xff]   ;;  %v564_v2 = vld [vmem:[#allocation5 + $0x8] sm:$0xff]   ;;  %v565_v3 = vld [vmem:[#allocation5 + $0x10] sm:$0xff]   ;;  %s203_s8 = scalar_lea.vmem [#allocation7], %s442_s7 }
  0x56   : > { %681 = vsyncadd (%p965_p2), [#allocation6], 4294966272  ;;  %480 = vmatprep.subr.bf16.mxu0 %v706_v0  ;;  %496 = vmatprep.mubr.msk.bf16.mxu0 %vm707_vm0, %v706_v0  ;;  %v566_v4 = vld [vmem:[#allocation5 + $0x18] sm:$0xff]   ;;  %v567_v5 = vld [vmem:[#allocation5 + $0x20] sm:$0xff]   ;;  %s351_s9 = sshll.u32 %s203_s8, 4  ;;  %s465_s4 = sshll.u32 %s752_s16, 7  ;;  %s899_s9 = int_to_ptr.vmem [resolvable:$true] %s351_s9 }
  0x57   : > { %481 = vmatpush3.bf16.msra.mxu0 %v563_v1  ;;  %v568_v6 = vld [vmem:[#allocation5 + $0x28] sm:$0xff]   ;;  %v569_v7 = vld [vmem:[#allocation5 + $0x30] sm:$0xff]   ;;  %v570_v8 = vld [vmem:[#allocation5 + $0x38] sm:$0xff]   ;;  %s904_s11 = scalar_lea.hbm %s951_s3, %s465_s4  ;;  %s338_s27 = scalar_lea.sflag [#allocation4], %s876_s6 }
  0x58   : > { %482 = vmatprep.subr.bf16.mxu0 %v706_v0  ;;  %v571_v9 = vld [vmem:[%s882_s26] sm:$0xff]   ;;  %s630_s28 = scalar_lea.vmem %s899_s9, 128  ;;  %s708_s16 = smov [#allocation7]  }
  0x59   : > { %v445_v10 = vld [vmem:[%s950_s2] ss:$0 sm:$0xff]  ;;  %p631_p4 = scmp.ne.s32.totalorder %s899_s9, %s630_s28  ;;  %s634_s23 = sshll.u32 %s708_s16, 4  ;;  %s635_s23 = int_to_ptr.vmem [resolvable:$false] %s634_s23 }
  0x5a   : > { %s636_s29 = scalar_lea.vmem %s635_s23, 256  ;;  %p637_p10 = scmp.lt.s32.totalorder %s899_s9, %s635_s23 }
  0x5b   : > { %483 = vmatpush3.bf16.msra.mxu0 %v564_v2  ;;  %p632_p6 = pnand %p631_p4, %p825_p12  ;;  %p638_p13 = scmp.lt.s32.totalorder %s636_s29, %s630_s28 }
  0x5c   : > { %484 = vmatprep.subr.bf16.mxu0 %v706_v0 }
  0x5d   : > { %p633_p8 = pneg %p632_p6  ;;  %p639_p3 = por %p638_p13, %p637_p10 }
  0x5f   : > { %485 = vmatpush3.bf16.msra.mxu0 %v565_v3  ;;  %p640_p7 = pnand %p639_p3, %p633_p8 }
  0x60   : > { %486 = vmatprep.subr.bf16.mxu0 %v706_v0 }
  0x63   : > { %487 = vmatpush3.bf16.msra.mxu0 %v566_v4 }
  0x64   : > { %488 = vmatprep.subr.bf16.mxu0 %v706_v0 }
  0x67   : > { %489 = vmatpush3.bf16.msra.mxu0 %v567_v5 }
  0x68   : > { %490 = vmatprep.subr.bf16.mxu0 %v706_v0 }
  0x6b   : > { %491 = vmatpush3.bf16.msra.mxu0 %v568_v6 }
  0x6c   : > { %492 = vmatprep.subr.bf16.mxu0 %v706_v0 }
  0x6f   : > { %493 = vmatpush3.bf16.msra.mxu0 %v569_v7 }
  0x70   : > { %494 = vmatprep.subr.bf16.mxu0 %v706_v0 }
  0x73   : > { %495 = vmatpush3.bf16.msra.mxu0 %v570_v8 }
  0x76   : > { %497 = vmatmul.mubr.bf16.vlgmr.msra.gmra.mrb[0].mxu0 %v571_v9 }
 0x149   : > { %v320_v11 = vpop.f32.mrb[0].mxu0 }
 0x14a   : > { %v498_v12 = vpop.f32.mrb[1].mxu0  ;;  %v321_v14 = vadd.f32 %v445_v10, %v320_v11 }
 0x14b   : > { %v323_v13 = vpop.f32.mrb[2].mxu0 }
 0x14c   : > { %v324_v15 = vadd.f32 %v445_v10, %v323_v13  ;;  %v499_v16 = vpop.f32.mrb[3].mxu0 }
 0x14e   : > { %v469_v17 = vpack.c.bf16 %v324_v15, %v321_v14 }
 0x150   : > { %470 = vst [vmem:[%s203_s8] sm:$0xff] %v469_v17  }
 0x151   : > { %643 = shalt.err (!%p640_p7)
}
 0x152   : > { %s644_s30 = scalar_lea.hbm %s904_s11, 128  ;;  %s648_s10 = scalar_lea.hbm %s951_s3, 256 }
 0x153   : > { %p645_p9 = scmp.ne.s32.totalorder %s904_s11, %s644_s30  ;;  %p649_p5 = scmp.lt.u32.totalorder %s904_s11, %s951_s3 }
 0x154   : > { %p650_p11 = scmp.lt.u32.totalorder %s648_s10, %s644_s30  ;;  %p652_p4 = scmp.lt.u32.totalorder %s644_s30, %s904_s11 }
 0x155   : > { %p646_p1 = pnand %p645_p9, %p825_p12 }
 0x156   : > { %p651_p2 = por %p650_p11, %p649_p5 }
 0x157   : > { %p647_p0 = pneg %p646_p1 }
 0x158   : > { %p653_p6 = por %p652_p4, %p651_p2 }
 0x15a   : > { %p654_p8 = pnand %p653_p6, %p647_p0 }
 0x15c   : > { %657 = shalt.err (!%p654_p8)
}
 0x15d   : > { %s709_s20 = smov 64   ;;  %s710_s8 = smov 4  }
 0x15e   : > { %506 = dma.vmem_to_hbm [thread:$0]  (%p825_p12), %s899_s9, 128, %s904_s11, %s338_s27, %s709_s20, %s709_s20, %s710_s8  }
 0x15f PF: > { %s366_s4 = sand.u32 1, %s688_s12   ;;  %p966_p10 = scmp.ne.s32.totalorder %s956_s19, 0 }
 0x160   : > { %p967_p13 = scmp.ge.s32.totalorder %s700_s15, 2  ;;  %s367_s25 = scalar_lea.sflag [#allocation4], %s366_s4 }
 0x162   : > { %p517_p3 = pnand %p967_p13, %p966_p10 }
 0x164   : > { %683 = dma.done.wait (!%p517_p3), %s367_s25, 128  }
 0x165   : > { %685 = vsyncadd (!%p517_p3), %s367_s25, 4294967168  ;;  %p17_p7 = scmp.ge.s32.totalorder %s787_s24, 4   ;;  %s968_s12 = smov %s692_s13 }
 0x166   : > { %s969_s13 = smov %s696_s14  ;;  %s970_s14 = smov %s821_s17 }
 0x167   : > { %s971_s15 = smov %s787_s24  ;;  %19 = sbr.rel (!%p17_p7) target bundleno = 6 (0x6), region = 81 }
 0x16e   :  { %372 = vsyncpa [#allocation3], 1 }
 0x16f   :  { %374 = vsyncpa [#allocation3 + $0x1], 1 }
 0x170   :  { %375 = vsyncpa [#allocation6], 1 }
 0x171   :  { %376 = vsyncpa [#allocation4], 1 }
 0x172   :  { %378 = vsyncpa [#allocation4 + $0x1], 1 }

</bundles_post_ra>
